<compile_context>
chip_gen: v7x
topology: tpu7x:2x2x1
jax: 0.10.0
libtpu: 0.0.40
codegen_flags: <defaults>
</compile_context>

<pallas_src>
import numpy as np
import jax
import jax.numpy as jnp
from jax.experimental import pallas as pl
from jax.experimental.pallas import tpu as pltpu

QUANTILES = [0.05, 0.5, 0.95]
IN_SHAPE = 1
H1, H2 = 64, 128
OUT_SHAPE = len(QUANTILES)
DROPOUT_P = 0.5


def _round_up(x: int, m: int) -> int:
    return ((x + m - 1) // m) * m


# ---------------------------------------------------------------------------
# Kernel
# ---------------------------------------------------------------------------
def _make_mlp_kernel(train: bool, dropout_p: float):
    keep_prob = 1.0 - dropout_p
    inv_keep = np.float32(1.0 / keep_prob) if keep_prob > 0.0 else np.float32(0.0)
    thresh = np.uint32(min(int(keep_prob * (2 ** 32)), 2 ** 32 - 1))

    def kernel(seed_ref, x_ref, w1_ref, b1_ref, w2_ref, b2_ref, w3_ref, b3_ref,
               o_ref):
        # x_ref: (1, TILE_N) f32   (lane-dense batch slice)
        x_row = x_ref[...]

        # --- Layer 1: Linear(1 -> 64) + ReLU, done on the VPU ---------------
        # (a K=1 matmul would waste an entire MXU pass on a rank-1 product)
        h1 = jnp.maximum(w1_ref[...] * x_row + b1_ref[...], 0.0)   # (H1, TILE_N)

        if train:
            # per-tile seed -> independent dropout masks across batch tiles
            pltpu.prng_seed(seed_ref[0] + pl.program_id(0))
            bits1 = pltpu.bitcast(pltpu.prng_random_bits(h1.shape), jnp.uint32)
            h1 = jnp.where(bits1 < thresh, h1 * inv_keep, 0.0)

        # --- Layer 2: Linear(64 -> 128) + ReLU (dominant MXU matmul) --------
        # bf16 operands, f32 accumulation.
        h2 = jnp.dot(w2_ref[...], h1.astype(jnp.bfloat16),
                     preferred_element_type=jnp.float32)           # (H2, TILE_N)
        h2 = jnp.maximum(h2 + b2_ref[...], 0.0)

        if train:
            bits2 = pltpu.bitcast(pltpu.prng_random_bits(h2.shape), jnp.uint32)
            h2 = jnp.where(bits2 < thresh, h2 * inv_keep, 0.0)

        # --- Layer 3: Linear(128 -> 3) ---------------------------------------
        out = jnp.dot(w3_ref[...], h2.astype(jnp.bfloat16),
                      preferred_element_type=jnp.float32)          # (OUT, TILE_N)
        o_ref[...] = (out + b3_ref[...]).astype(o_ref.dtype)

    return kernel


# ---------------------------------------------------------------------------
# Wrapper
# ---------------------------------------------------------------------------
def q_model_forward(params, x, *, train: bool = False, seed: int = 0,
                    dropout_p: float = DROPOUT_P, tile_n: int = 4096):
    """Fused MLP forward.  x: [N, IN_SHAPE] float32 -> [N, OUT_SHAPE] float32."""
    n, in_shape = x.shape
    assert in_shape == IN_SHAPE == 1, "kernel assumes in_shape == 1 (module default)"

    w1, b1, w2, b2, w3, b3 = params  # torch layout: w (out, in), b (out,)

    # Effective batch tile: multiple of 128 (lane-dense), capped by tile_n.
    eff_tile = min(tile_n, _round_up(n, 128))
    n_pad = _round_up(n, eff_tile)
    grid_n = n_pad // eff_tile

    # Lane-dense, transposed input: (1, N_pad)
    x_t = jnp.pad(x.astype(jnp.float32).reshape(1, n), ((0, 0), (0, n_pad - n)))

    # Parameters in the feature-major layout the kernel expects.
    w1_c = w1.astype(jnp.float32).reshape(H1, IN_SHAPE)        # (64, 1)
    b1_c = b1.astype(jnp.float32).reshape(H1, 1)               # (64, 1)
    w2_c = w2.astype(jnp.bfloat16)                             # (128, 64)
    b2_c = b2.astype(jnp.float32).reshape(H2, 1)               # (128, 1)
    w3_c = w3.astype(jnp.bfloat16)                             # (3, 128)
    b3_c = b3.astype(jnp.float32).reshape(OUT_SHAPE, 1)        # (3, 1)

    seed_arr = jnp.asarray([seed], dtype=jnp.int32)

    kernel = _make_mlp_kernel(train, dropout_p)

    full = lambda i, seed: (0, 0)      # weights/biases: resident across grid
    tile = lambda i, seed: (0, i)      # batch-tiled arrays

    grid_spec = pltpu.PrefetchScalarGridSpec(
        num_scalar_prefetch=1,
        grid=(grid_n,),
        in_specs=[
            pl.BlockSpec((1, eff_tile), tile),            # x_t
            pl.BlockSpec((H1, IN_SHAPE), full),           # w1
            pl.BlockSpec((H1, 1), full),                  # b1
            pl.BlockSpec((H2, H1), full),                 # w2
            pl.BlockSpec((H2, 1), full),                  # b2
            pl.BlockSpec((OUT_SHAPE, H2), full),          # w3
            pl.BlockSpec((OUT_SHAPE, 1), full),           # b3
        ],
        out_specs=pl.BlockSpec((OUT_SHAPE, eff_tile), tile),
    )

    flops = 2 * n * (IN_SHAPE * H1 + H1 * H2 + H2 * OUT_SHAPE)
    bytes_accessed = (n * (IN_SHAPE + OUT_SHAPE) * 4
                      + w1_c.size * 4 + b1_c.size * 4
                      + w2_c.size * 2 + b2_c.size * 4
                      + w3_c.size * 2 + b3_c.size * 4)

    out_t = pl.pallas_call(
        kernel,
        out_shape=jax.ShapeDtypeStruct((OUT_SHAPE, n_pad), jnp.float32),
        grid_spec=grid_spec,
        compiler_params=pltpu.CompilerParams(
            dimension_semantics=("parallel",)),
        cost_estimate=pl.CostEstimate(flops=flops, transcendentals=0,
                                      bytes_accessed=bytes_accessed),
    )(seed_arr, x_t, w1_c, b1_c, w2_c, b2_c, w3_c, b3_c)

    # (OUT, N_pad) -> (N, OUT)
    return out_t[:, :n].T


# ---------------------------------------------------------------------------
# Deterministic parameter init (mimics nn.init.orthogonal_ + zero bias)
# ---------------------------------------------------------------------------
def _orthogonal(key, shape):
    """Orthogonal init for a torch Linear weight of shape (out, in)."""
    rows, cols = shape
    transpose = rows < cols
    mat_shape = (cols, rows) if transpose else (rows, cols)
    a = jax.random.normal(key, mat_shape, dtype=jnp.float32)
    q, r = jnp.linalg.qr(a)
    d = jnp.sign(jnp.diagonal(r))
    q = q * d[None, :]
    if transpose:
        q = q.T
    return q.astype(jnp.float32)


def init_params(key):
    k1, k2, k3 = jax.random.split(key, 3)
    # torch layout: weight (out, in), bias (out,)
    return (
        _orthogonal(k1, (H1, IN_SHAPE)), jnp.zeros((H1,), jnp.float32),
        _orthogonal(k2, (H2, H1)),       jnp.zeros((H2,), jnp.float32),
        _orthogonal(k3, (OUT_SHAPE, H2)), jnp.zeros((OUT_SHAPE,), jnp.float32),
    )


def reference_forward(params, x):
    """Pure-JAX f32 reference with torch semantics (eval mode)."""
    w1, b1, w2, b2, w3, b3 = params
    h1 = jnp.maximum(x @ w1.T + b1, 0.0)
    h2 = jnp.maximum(h1 @ w2.T + b2, 0.0)
    return h2 @ w3.T + b3


# ---------------------------------------------------------------------------
if __name__ == "__main__":
    key = jax.random.PRNGKey(0)
    pkey, xkey = jax.random.split(key)

    params = init_params(pkey)
    x = jax.random.normal(xkey, (8, IN_SHAPE), dtype=jnp.float32)  # batch=8

    # Eval-mode forward (dropout = identity) -- deterministic.
    out = q_model_forward(params, x, train=False)
    out = jax.block_until_ready(out)

    ref = reference_forward(params, x)
    # bf16 MXU operands with f32 accumulation -> small numeric delta vs f32 ref.
    np.testing.assert_allclose(np.asarray(out), np.asarray(ref),
                               rtol=2e-2, atol=2e-2)

    assert out.shape == (8, OUT_SHAPE)
    print("KERNEL_OK")
</pallas_src>

<mosaic_0001>
module attributes {stable_mosaic.version = 11 : i64} {
  func.func @kernel(%arg0: i32, %arg1: memref<1xi32, #tpu.memory_space<smem>>, %arg2: memref<1x128xf32, #tpu.memory_space<vmem>>, %arg3: memref<64x1xf32, #tpu.memory_space<vmem>>, %arg4: memref<64x1xf32, #tpu.memory_space<vmem>>, %arg5: memref<128x64xbf16, #tpu.memory_space<vmem>>, %arg6: memref<128x1xf32, #tpu.memory_space<vmem>>, %arg7: memref<3x128xbf16, #tpu.memory_space<vmem>>, %arg8: memref<3x1xf32, #tpu.memory_space<vmem>>, %arg9: memref<3x128xf32, #tpu.memory_space<vmem>>) attributes {dimension_semantics = [#tpu.dimension_semantics<parallel>], iteration_bounds = array<i64: 1>, scalar_prefetch = 1 : i64, scratch_operands = 0 : i64, tpu.core_type = #tpu.core_type<tc>, window_params = [{transform_indices = @transform_0, window_bounds = array<i64: 1, 128>}, {pipeline_mode = #tpu.pipeline_mode<synchronous>, transform_indices = @transform_1, window_bounds = array<i64: 64, 1>}, {pipeline_mode = #tpu.pipeline_mode<synchronous>, transform_indices = @transform_2, window_bounds = array<i64: 64, 1>}, {pipeline_mode = #tpu.pipeline_mode<synchronous>, transform_indices = @transform_3, window_bounds = array<i64: 128, 64>}, {pipeline_mode = #tpu.pipeline_mode<synchronous>, transform_indices = @transform_4, window_bounds = array<i64: 128, 1>}, {pipeline_mode = #tpu.pipeline_mode<synchronous>, transform_indices = @transform_5, window_bounds = array<i64: 3, 128>}, {pipeline_mode = #tpu.pipeline_mode<synchronous>, transform_indices = @transform_6, window_bounds = array<i64: 3, 1>}, {transform_indices = @transform_7, window_bounds = array<i64: 3, 128>}]} {
    %c0 = arith.constant 0 : index
    %c0_0 = arith.constant 0 : index
    %0 = vector.load %arg2[%c0, %c0_0] : memref<1x128xf32, #tpu.memory_space<vmem>>, vector<1x128xf32>
    %c0_1 = arith.constant 0 : index
    %c0_2 = arith.constant 0 : index
    %1 = vector.load %arg3[%c0_1, %c0_2] : memref<64x1xf32, #tpu.memory_space<vmem>>, vector<64x1xf32>
    %2 = vector.broadcast %1 : vector<64x1xf32> to vector<64x128xf32>
    %3 = vector.broadcast %0 : vector<1x128xf32> to vector<64x128xf32>
    %4 = arith.mulf %2, %3 : vector<64x128xf32>
    %c0_3 = arith.constant 0 : index
    %c0_4 = arith.constant 0 : index
    %5 = vector.load %arg4[%c0_3, %c0_4] : memref<64x1xf32, #tpu.memory_space<vmem>>, vector<64x1xf32>
    %6 = vector.broadcast %5 : vector<64x1xf32> to vector<64x128xf32>
    %7 = arith.addf %4, %6 : vector<64x128xf32>
    %cst = arith.constant 0.000000e+00 : f32
    %8 = vector.broadcast %cst : f32 to vector<64x128xf32>
    %9 = arith.maximumf %7, %8 : vector<64x128xf32>
    %c0_5 = arith.constant 0 : index
    %c0_6 = arith.constant 0 : index
    %10 = vector.load %arg5[%c0_5, %c0_6] : memref<128x64xbf16, #tpu.memory_space<vmem>>, vector<128x64xbf16>
    %11 = arith.truncf %9 : vector<64x128xf32> to vector<64x128xbf16>
    %cst_7 = arith.constant dense<0.000000e+00> : vector<128x128xf32>
    %12 = tpu.matmul %10, %11, %cst_7 {dimension_numbers = #tpu.dot_dimension_numbers<[1], [0], [0], [1], [0, 0, 1, 1], [], []>} : vector<128x64xbf16>, vector<64x128xbf16>, vector<128x128xf32> -> vector<128x128xf32>
    %c0_8 = arith.constant 0 : index
    %c0_9 = arith.constant 0 : index
    %13 = vector.load %arg6[%c0_8, %c0_9] : memref<128x1xf32, #tpu.memory_space<vmem>>, vector<128x1xf32>
    %14 = vector.broadcast %13 : vector<128x1xf32> to vector<128x128xf32>
    %15 = arith.addf %12, %14 : vector<128x128xf32>
    %cst_10 = arith.constant 0.000000e+00 : f32
    %16 = vector.broadcast %cst_10 : f32 to vector<128x128xf32>
    %17 = arith.maximumf %15, %16 : vector<128x128xf32>
    %c0_11 = arith.constant 0 : index
    %c0_12 = arith.constant 0 : index
    %18 = vector.load %arg7[%c0_11, %c0_12] : memref<3x128xbf16, #tpu.memory_space<vmem>>, vector<3x128xbf16>
    %19 = arith.truncf %17 : vector<128x128xf32> to vector<128x128xbf16>
    %cst_13 = arith.constant dense<0.000000e+00> : vector<3x128xf32>
    %20 = tpu.matmul %18, %19, %cst_13 {dimension_numbers = #tpu.dot_dimension_numbers<[1], [0], [0], [1], [0, 0, 1, 1], [], []>} : vector<3x128xbf16>, vector<128x128xbf16>, vector<3x128xf32> -> vector<3x128xf32>
    %c0_14 = arith.constant 0 : index
    %c0_15 = arith.constant 0 : index
    %21 = vector.load %arg8[%c0_14, %c0_15] : memref<3x1xf32, #tpu.memory_space<vmem>>, vector<3x1xf32>
    %22 = vector.broadcast %21 : vector<3x1xf32> to vector<3x128xf32>
    %23 = arith.addf %20, %22 : vector<3x128xf32>
    %c0_16 = arith.constant 0 : index
    %c0_17 = arith.constant 0 : index
    %24 = vector.load %arg9[%c0_16, %c0_17] : memref<3x128xf32, #tpu.memory_space<vmem>>, vector<3x128xf32>
    tpu.vector_store %arg9[%c0_16, %c0_17], %23 {strides = array<i32>} : memref<3x128xf32, #tpu.memory_space<vmem>>, vector<3x128xf32>,
    return
  }
  func.func @transform_0(%arg0: i32, %arg1: memref<1xi32, #tpu.memory_space<smem>>) -> (i32, i32) {
    %c0_i32 = arith.constant 0 : i32
    %c0_i32_0 = arith.constant 0 : i32
    return %c0_i32, %arg0 : i32, i32
  }
  func.func @transform_1(%arg0: i32, %arg1: memref<1xi32, #tpu.memory_space<smem>>) -> (i32, i32) {
    %c0_i32 = arith.constant 0 : i32
    %c0_i32_0 = arith.constant 0 : i32
    %c0_i32_1 = arith.constant 0 : i32
    return %c0_i32, %c0_i32_0 : i32, i32
  }
  func.func @transform_2(%arg0: i32, %arg1: memref<1xi32, #tpu.memory_space<smem>>) -> (i32, i32) {
    %c0_i32 = arith.constant 0 : i32
    %c0_i32_0 = arith.constant 0 : i32
    %c0_i32_1 = arith.constant 0 : i32
    return %c0_i32, %c0_i32_0 : i32, i32
  }
  func.func @transform_3(%arg0: i32, %arg1: memref<1xi32, #tpu.memory_space<smem>>) -> (i32, i32) {
    %c0_i32 = arith.constant 0 : i32
    %c0_i32_0 = arith.constant 0 : i32
    %c0_i32_1 = arith.constant 0 : i32
    return %c0_i32, %c0_i32_0 : i32, i32
  }
  func.func @transform_4(%arg0: i32, %arg1: memref<1xi32, #tpu.memory_space<smem>>) -> (i32, i32) {
    %c0_i32 = arith.constant 0 : i32
    %c0_i32_0 = arith.constant 0 : i32
    %c0_i32_1 = arith.constant 0 : i32
    return %c0_i32, %c0_i32_0 : i32, i32
  }
  func.func @transform_5(%arg0: i32, %arg1: memref<1xi32, #tpu.memory_space<smem>>) -> (i32, i32) {
    %c0_i32 = arith.constant 0 : i32
    %c0_i32_0 = arith.constant 0 : i32
    %c0_i32_1 = arith.constant 0 : i32
    return %c0_i32, %c0_i32_0 : i32, i32
  }
  func.func @transform_6(%arg0: i32, %arg1: memref<1xi32, #tpu.memory_space<smem>>) -> (i32, i32) {
    %c0_i32 = arith.constant 0 : i32
    %c0_i32_0 = arith.constant 0 : i32
    %c0_i32_1 = arith.constant 0 : i32
    return %c0_i32, %c0_i32_0 : i32, i32
  }
  func.func @transform_7(%arg0: i32, %arg1: memref<1xi32, #tpu.memory_space<smem>>) -> (i32, i32) {
    %c0_i32 = arith.constant 0 : i32
    %c0_i32_0 = arith.constant 0 : i32
    return %c0_i32, %arg0 : i32, i32
  }
}

</mosaic_0001>

<bundles_post_ra>
// kernel: tpu_custom_call.1
= control target key start
LH: loop header
LB: loop body
LE: loop exit
PB: predicated region body
PF: predicated region fallthrough
CT: control target
= control target key end

     0   :  { %v641_v2 = vmov 0   ;;  %s848_s0 = inlined_call_operand.<no memory space> [shape: s32[1], index: 0, kind: input, shape index: {}]   ;;  %s849_s1 = inlined_call_operand.vmem [shape: f32[1,128], index: 1, kind: input, shape index: {}]   ;;  %s850_s2 = inlined_call_operand.vmem [shape: f32[64,1], index: 2, kind: input, shape index: {}]   ;;  %s851_s3 = inlined_call_operand.vmem [shape: f32[64,1], index: 3, kind: input, shape index: {}]   ;;  %s852_s4 = inlined_call_operand.vmem [shape: bf16[128,64], index: 4, kind: input, shape index: {}]   ;;  %s853_s5 = inlined_call_operand.vmem [shape: f32[128,1], index: 5, kind: input, shape index: {}]   ;;  %s854_s6 = inlined_call_operand.vmem [shape: bf16[3,128], index: 6, kind: input, shape index: {}]   ;;  %s855_s7 = inlined_call_operand.vmem [shape: f32[3,1], index: 7, kind: input, shape index: {}]   ;;  %s856_s8 = inlined_call_operand.hbm [shape: f32[3,128], index: 8, kind: output, shape index: {}]  }
   0x1   :  { %v93_v0 = vld [vmem:[%s851_s3] sm:$0xff]  ;;  %608 = vset.pattern.permute.xlu1 %v641_v2  ;;  %607 = vset.pattern.permute.xlu0 %v641_v2  ;;  %v94_v3 = vld [vmem:[%s851_s3 + $0x8] sm:$0xff]  ;;  %v34_v5 = vld [vmem:[%s850_s2 + $0x18] sm:$0xff] }
   0x2   :  { %v31_v1 = vld [vmem:[%s850_s2] sm:$0xff]  ;;  %103 = vperm.xlu1 %608, %v93_v0   ;;  %v32_v4 = vld [vmem:[%s850_s2 + $0x8] sm:$0xff]  ;;  %v33_v6 = vld [vmem:[%s850_s2 + $0x10] sm:$0xff] }
   0x3   :  { %41 = vperm.xlu0 %607, %v31_v1   ;;  %v96_v7 = vld [vmem:[%s851_s3 + $0x18] sm:$0xff]  ;;  %v95_v8 = vld [vmem:[%s851_s3 + $0x10] sm:$0xff]  ;;  %v36_v9 = vld [vmem:[%s850_s2 + $0x28] sm:$0xff] }
   0x4   :  { %v35_v10 = vld [vmem:[%s850_s2 + $0x20] sm:$0xff] }
   0x6   :  { %108 = vperm.xlu1 %608, %v94_v3  }
   0x7   :  { %46 = vperm.xlu0 %607, %v32_v4  }
   0xa   :  { %56 = vperm.xlu1 %608, %v34_v5  }
   0xb   :  { %51 = vperm.xlu0 %607, %v33_v6  }
   0xe   :  { %118 = vperm.xlu1 %608, %v96_v7  }
   0xf   :  { %113 = vperm.xlu0 %607, %v95_v8  }
  0x10   :  { %14 = vsyncpa [#allocation5], 0  ;;  %v98_v11 = vld [vmem:[%s851_s3 + $0x28] sm:$0xff]  ;;  %v97_v12 = vld [vmem:[%s851_s3 + $0x20] sm:$0xff]  ;;  %vm313_vm0 = vcmask 523264   ;;  %vm643_vm1 = vmmov 0  }
  0x11   :  { %v38_v13 = vld [vmem:[%s850_s2 + $0x38] sm:$0xff]  ;;  %v37_v14 = vld [vmem:[%s850_s2 + $0x30] sm:$0xff]  ;;  %v178_v17 = vld [vmem:[%s853_s5 + $0x8] sm:$0xff]  ;;  %s644_s13 = smov [#allocation4]  }
  0x12   :  { %66 = vperm.xlu1 %608, %v36_v9   ;;  %v100_v15 = vld [vmem:[%s851_s3 + $0x38] sm:$0xff]  ;;  %v99_v16 = vld [vmem:[%s851_s3 + $0x30] sm:$0xff]  ;;  %v177_v18 = vld [vmem:[%s853_s5] sm:$0xff]  ;;  %s513_s14 = sshll.u32 %s644_s13, 4  ;;  %s514_s14 = int_to_ptr.vmem [resolvable:$true] %s513_s14 }
  0x13   :  { %61 = vperm.xlu0 %607, %v35_v10   ;;  %v180_v19 = vld [vmem:[%s853_s5 + $0x18] sm:$0xff]  ;;  %v179_v20 = vld [vmem:[%s853_s5 + $0x10] sm:$0xff]  ;;  %v609_v21 = vld [vmem:[%s852_s4] sm:$0xff]   ;;  %s617_s15 = scalar_lea.vmem %s514_s14, 64  ;;  %p622_p1 = scmp.lt.s32.totalorder %s514_s14, %s514_s14 }
  0x14   :  { %v182_v22 = vld [vmem:[%s853_s5 + $0x28] sm:$0xff]  ;;  %v181_v23 = vld [vmem:[%s853_s5 + $0x20] sm:$0xff]  ;;  %567 = vmatprep.mubr.msk.bf16.mxu0 %vm313_vm0, %v609_v21  ;;  %v184_v24 = vld [vmem:[%s853_s5 + $0x38] sm:$0xff]  ;;  %p618_p0 = scmp.ne.s32.totalorder %s514_s14, %s617_s15  ;;  %p623_p2 = scmp.lt.s32.totalorder %s617_s15, %s617_s15 }
  0x15   :  { %v183_v25 = vld [vmem:[%s853_s5 + $0x30] sm:$0xff]  ;;  %v186_v26 = vld [vmem:[%s853_s5 + $0x48] sm:$0xff]  ;;  %v185_v27 = vld [vmem:[%s853_s5 + $0x40] sm:$0xff] }
  0x16   :  { %128 = vperm.xlu1 %608, %v98_v11   ;;  %v188_v28 = vld [vmem:[%s853_s5 + $0x58] sm:$0xff]  ;;  %v187_v29 = vld [vmem:[%s853_s5 + $0x50] sm:$0xff]  ;;  %v190_v30 = vld [vmem:[%s853_s5 + $0x68] sm:$0xff]  ;;  %p624_p3 = por %p623_p2, %p622_p1 }
  0x17   :  { %123 = vperm.xlu0 %607, %v97_v12   ;;  %v189_v31 = vld [vmem:[%s853_s5 + $0x60] sm:$0xff]  ;;  %v192_v32 = vld [vmem:[%s853_s5 + $0x78] sm:$0xff]  ;;  %v191_v33 = vld [vmem:[%s853_s5 + $0x70] sm:$0xff] }
  0x18   :  { %v460_v34 = vld [vmem:[%s855_s7] sm:$0x7]  ;;  %v615_v21 = vld [vmem:[%s852_s4 + $0x30] sm:$0xff]   ;;  %p625_p4 = pnand %p624_p3, %p618_p0 }
  0x19   :  { %v521_v35 = vld [vmem:[%s849_s1] ss:$0 sm:$0xff] }
  0x1a   :  { %76 = vperm.xlu1 %608, %v38_v13  }
  0x1b   :  { %71 = vperm.xlu0 %607, %v37_v14  }
  0x1e   :  { %138 = vperm.xlu1 %608, %v100_v15  }
  0x1f   :  { %133 = vperm.xlu0 %607, %v99_v16   ;;  %v610_v16 = vld [vmem:[%s852_s4 + $0x8] sm:$0xff]  }
  0x22   :  { %200 = vperm.xlu1 %608, %v178_v17   ;;  %v611_v17 = vld [vmem:[%s852_s4 + $0x10] sm:$0xff]  }
  0x23   :  { %195 = vperm.xlu0 %607, %v177_v18   ;;  %v612_v18 = vld [vmem:[%s852_s4 + $0x18] sm:$0xff]  }
  0x26   :  { %210 = vperm.xlu1 %608, %v180_v19   ;;  %v613_v19 = vld [vmem:[%s852_s4 + $0x20] sm:$0xff]  }
  0x27   :  { %205 = vperm.xlu0 %607, %v179_v20   ;;  %v614_v20 = vld [vmem:[%s852_s4 + $0x28] sm:$0xff]  }
  0x2a   :  { %220 = vperm.xlu1 %608, %v182_v22   ;;  %v616_v22 = vld [vmem:[%s852_s4 + $0x38] sm:$0xff]  }
  0x2b   :  { %215 = vperm.xlu0 %607, %v181_v23   ;;  %v642_v23 = vmov 0.0  }
  0x2c   :  { %583 = vmatprep.subr.bf16.mxu1 %v642_v23  ;;  %599 = vmatprep.mubr.msk.bf16.mxu1 %vm643_vm1, %v642_v23 }
  0x2e   :  { %230 = vperm.xlu1 %608, %v184_v24  }
  0x2f   :  { %225 = vperm.xlu0 %607, %v183_v25  }
  0x32   :  { %240 = vperm.xlu1 %608, %v186_v26  }
  0x33   :  { %235 = vperm.xlu0 %607, %v185_v27  }
  0x36   :  { %250 = vperm.xlu1 %608, %v188_v28  }
  0x37   :  { %245 = vperm.xlu0 %607, %v187_v29  }
  0x3a   :  { %260 = vperm.xlu1 %608, %v190_v30  }
  0x3b   :  { %255 = vperm.xlu0 %607, %v189_v31  }
  0x3e   :  { %270 = vperm.xlu1 %608, %v192_v32  }
  0x3f   :  { %265 = vperm.xlu0 %607, %v191_v33  }
  0x43   :  { %463 = vperm.xlu0 %607, %v460_v34  }
  0x81   :  { %v104_v36 = vpop.permute.xlu1 %103 }
  0x82   :  { %v42_v37 = vpop.permute.xlu0 %41 }
  0x83   :  { %v85_v38 = vmul.f32 %v521_v35, %v42_v37 }
  0x85   :  { %v109_v39 = vpop.permute.xlu1 %108  ;;  %v141_v41 = vadd.f32 %v104_v36, %v85_v38 }
  0x86   :  { %v47_v40 = vpop.permute.xlu0 %46 }
  0x87   :  { %v86_v42 = vmul.f32 %v521_v35, %v47_v40  ;;  %v149_v46 = vmax.f32 %v141_v41, 0.0 }
  0x89   :  { %v142_v43 = vadd.f32 %v109_v39, %v86_v42  ;;  %v57_v44 = vpop.permute.xlu1 %56 }
  0x8a   :  { %v52_v45 = vpop.permute.xlu0 %51  ;;  %v88_v48 = vmul.f32 %v521_v35, %v57_v44 }
  0x8b   :  { %v150_v47 = vmax.f32 %v142_v43, 0.0  ;;  %v87_v49 = vmul.f32 %v521_v35, %v52_v45 }
  0x8d   :  { %v173_v50 = vpack.c.bf16 %v150_v47, %v149_v46  ;;  %v119_v51 = vpop.permute.xlu1 %118 }
  0x8e   :  { %v114_v52 = vpop.permute.xlu0 %113  ;;  %v144_v53 = vadd.f32 %v119_v51, %v88_v48 }
  0x8f   :  { %v143_v54 = vadd.f32 %v114_v52, %v87_v49  ;;  %559 = vmatprep.subr.bf16.mxu0 %v173_v50 }
  0x90   :  { %560 = vmatpush3.bf16.msra.mxu0 %v173_v50  ;;  %v152_v55 = vmax.f32 %v144_v53, 0.0 }
  0x91   :  { %v151_v56 = vmax.f32 %v143_v54, 0.0  ;;  %v67_v57 = vpop.permute.xlu1 %66 }
  0x92   :  { %v62_v58 = vpop.permute.xlu0 %61  ;;  %v90_v60 = vmul.f32 %v521_v35, %v67_v57 }
  0x93   :  { %v174_v59 = vpack.c.bf16 %v152_v55, %v151_v56  ;;  %v89_v61 = vmul.f32 %v521_v35, %v62_v58 }
  0x95   :  { %561 = vmatprep.subr.bf16.mxu0 %v174_v59  ;;  %v129_v62 = vpop.permute.xlu1 %128 }
  0x96   :  { %v124_v63 = vpop.permute.xlu0 %123  ;;  %562 = vmatpush3.bf16.msra.mxu0 %v174_v59  ;;  %v146_v0 = vadd.f32 %v129_v62, %v90_v60 }
  0x97   :  { %v145_v1 = vadd.f32 %v124_v63, %v89_v61 }
  0x98   :  { %v154_v2 = vmax.f32 %v146_v0, 0.0 }
  0x99   :  { %v153_v3 = vmax.f32 %v145_v1, 0.0  ;;  %v77_v4 = vpop.permute.xlu1 %76 }
  0x9a   :  { %v72_v5 = vpop.permute.xlu0 %71  ;;  %v92_v7 = vmul.f32 %v521_v35, %v77_v4 }
  0x9b   :  { %v175_v6 = vpack.c.bf16 %v154_v2, %v153_v3  ;;  %v91_v8 = vmul.f32 %v521_v35, %v72_v5 }
  0x9d   :  { %563 = vmatprep.subr.bf16.mxu0 %v175_v6  ;;  %v139_v9 = vpop.permute.xlu1 %138 }
  0x9e   :  { %v134_v10 = vpop.permute.xlu0 %133  ;;  %564 = vmatpush3.bf16.msra.mxu0 %v175_v6  ;;  %v148_v11 = vadd.f32 %v139_v9, %v92_v7 }
  0x9f   :  { %v147_v12 = vadd.f32 %v134_v10, %v91_v8 }
  0xa0   :  { %v156_v13 = vmax.f32 %v148_v11, 0.0 }
  0xa1   :  { %v155_v14 = vmax.f32 %v147_v12, 0.0  ;;  %v201_v25 = vpop.permute.xlu1 %200 }
  0xa2   :  { %v196_v24 = vpop.permute.xlu0 %195 }
  0xa3   :  { %v176_v15 = vpack.c.bf16 %v156_v13, %v155_v14 }
  0xa5   :  { %565 = vmatprep.subr.bf16.mxu0 %v176_v15  ;;  %v211_v27 = vpop.permute.xlu1 %210 }
  0xa6   :  { %566 = vmatpush3.bf16.msra.mxu0 %v176_v15  ;;  %v206_v26 = vpop.permute.xlu0 %205 }
  0xa9   :  { %568 = vmatmul.mubr.msk.bf16.vlgmr.msra.gmra.mrb[0].mxu0 %vm313_vm0, %v610_v16  ;;  %v221_v29 = vpop.permute.xlu1 %220 }
  0xaa   :  { %571 = vmatprep.mubr.msk.bf16.mxu0 %vm313_vm0, %v611_v17  ;;  %v216_v28 = vpop.permute.xlu0 %215 }
  0xad   :  { %v231_v34 = vpop.permute.xlu1 %230 }
  0xae   :  { %v226_v30 = vpop.permute.xlu0 %225 }
  0xb1   :  { %572 = vmatmul.mubr.msk.bf16.gmra.mrb[4].mxu0 %vm313_vm0, %v612_v18  ;;  %v241_v46 = vpop.permute.xlu1 %240 }
  0xb2   :  { %575 = vmatprep.mubr.msk.bf16.mxu0 %vm313_vm0, %v613_v19  ;;  %v236_v42 = vpop.permute.xlu0 %235 }
  0xb5   :  { %v251_v59 = vpop.permute.xlu1 %250 }
  0xb6   :  { %v246_v55 = vpop.permute.xlu0 %245 }
  0xb9   :  { %576 = vmatmul.mubr.msk.bf16.gmra.mrb[8].mxu0 %vm313_vm0, %v614_v20  ;;  %v261_v8 = vpop.permute.xlu1 %260 }
  0xba   :  { %579 = vmatprep.mubr.msk.bf16.mxu0 %vm313_vm0, %v615_v21  ;;  %v256_v3 = vpop.permute.xlu0 %255 }
  0xbd   :  { %v271_v20 = vpop.permute.xlu1 %270 }
  0xbe   :  { %v266_v15 = vpop.permute.xlu0 %265 }
  0xc1   :  { %580 = vmatmul.mubr.msk.bf16.gmra.mrb[12].mxu0 %vm313_vm0, %v616_v22 }
 0x17c   :  { %v569_v31 = vpop.f32.mrb[0].mxu0 }
 0x17d   :  { %v381_v32 = vadd.f32 %v569_v31, %v206_v26  ;;  %v372_v33 = vpop.f32.mrb[1].mxu0 }
 0x17e   :  { %v373_v35 = vadd.f32 %v372_v33, %v196_v24  ;;  %v570_v36 = vpop.f32.mrb[2].mxu0  ;;  %v451_v33 = vld [vmem:[%s854_s6] sm:$0x3] }
 0x17f   :  { %v384_v37 = vadd.f32 %v570_v36, %v211_v27  ;;  %v375_v38 = vpop.f32.mrb[3].mxu0  ;;  %v437_v40 = vmax.f32 %v381_v32, 0.0 }
 0x180   :  { %v376_v39 = vadd.f32 %v375_v38, %v201_v25  ;;  %v435_v43 = vmax.f32 %v373_v35, 0.0 }
 0x181   :  { %v438_v41 = vmax.f32 %v384_v37, 0.0 }
 0x182   :  { %v436_v44 = vmax.f32 %v376_v39, 0.0 }
 0x183   :  { %v453_v45 = vpack.c.bf16 %v438_v41, %v437_v40 }
 0x184   :  { %v573_v47 = vpop.f32.mrb[4].mxu0  ;;  %v452_v48 = vpack.c.bf16 %v436_v44, %v435_v43 }
 0x185   :  { %v397_v49 = vadd.f32 %v573_v47, %v226_v30  ;;  %v388_v50 = vpop.f32.mrb[5].mxu0 }
 0x186   :  { %v389_v51 = vadd.f32 %v388_v50, %v216_v28  ;;  %v574_v52 = vpop.f32.mrb[6].mxu0  ;;  %584 = vmatpush3.bf16.msra.mxu1 %v452_v48 }
 0x187   :  { %v400_v53 = vadd.f32 %v574_v52, %v231_v34  ;;  %v391_v54 = vpop.f32.mrb[7].mxu0  ;;  %585 = vmatprep.subr.bf16.mxu1 %v642_v23  ;;  %v441_v57 = vmax.f32 %v397_v49, 0.0  ;;  %v464_v34 = vpop.permute.xlu0 %463 }
 0x188   :  { %v392_v56 = vadd.f32 %v391_v54, %v221_v29  ;;  %v439_v60 = vmax.f32 %v389_v51, 0.0 }
 0x189   :  { %v442_v58 = vmax.f32 %v400_v53, 0.0 }
 0x18a   :  { %v440_v61 = vmax.f32 %v392_v56, 0.0  ;;  %586 = vmatpush3.bf16.msra.mxu1 %v453_v45 }
 0x18b   :  { %v455_v62 = vpack.c.bf16 %v442_v58, %v441_v57  ;;  %587 = vmatprep.subr.bf16.mxu1 %v642_v23 }
 0x18c   :  { %v454_v63 = vpack.c.bf16 %v440_v61, %v439_v60  ;;  %v577_v0 = vpop.f32.mrb[8].mxu0 }
 0x18d   :  { %v413_v1 = vadd.f32 %v577_v0, %v246_v55  ;;  %v404_v2 = vpop.f32.mrb[9].mxu0 }
 0x18e   :  { %v405_v4 = vadd.f32 %v404_v2, %v236_v42  ;;  %v578_v5 = vpop.f32.mrb[10].mxu0  ;;  %588 = vmatpush3.bf16.msra.mxu1 %v454_v63 }
 0x18f   :  { %v416_v6 = vadd.f32 %v578_v5, %v251_v59  ;;  %v407_v7 = vpop.f32.mrb[11].mxu0  ;;  %589 = vmatprep.subr.bf16.mxu1 %v642_v23  ;;  %v445_v10 = vmax.f32 %v413_v1, 0.0 }
 0x190   :  { %v408_v9 = vadd.f32 %v407_v7, %v241_v46  ;;  %v443_v12 = vmax.f32 %v405_v4, 0.0 }
 0x191   :  { %v446_v11 = vmax.f32 %v416_v6, 0.0 }
 0x192   :  { %v444_v13 = vmax.f32 %v408_v9, 0.0  ;;  %590 = vmatpush3.bf16.msra.mxu1 %v455_v62 }
 0x193   :  { %v457_v14 = vpack.c.bf16 %v446_v11, %v445_v10  ;;  %591 = vmatprep.subr.bf16.mxu1 %v642_v23 }
 0x194   :  { %v456_v16 = vpack.c.bf16 %v444_v13, %v443_v12  ;;  %v581_v17 = vpop.f32.mrb[12].mxu0 }
 0x195   :  { %v429_v18 = vadd.f32 %v581_v17, %v266_v15  ;;  %v420_v19 = vpop.f32.mrb[13].mxu0 }
 0x196   :  { %v421_v21 = vadd.f32 %v420_v19, %v256_v3  ;;  %v582_v22 = vpop.f32.mrb[14].mxu0  ;;  %592 = vmatpush3.bf16.msra.mxu1 %v456_v16 }
 0x197   :  { %v432_v24 = vadd.f32 %v582_v22, %v271_v20  ;;  %v423_v25 = vpop.f32.mrb[15].mxu0  ;;  %593 = vmatprep.subr.bf16.mxu1 %v642_v23  ;;  %v449_v27 = vmax.f32 %v429_v18, 0.0 }
 0x198   :  { %v424_v26 = vadd.f32 %v423_v25, %v261_v8  ;;  %v447_v29 = vmax.f32 %v421_v21, 0.0 }
 0x199   :  { %v450_v28 = vmax.f32 %v432_v24, 0.0 }
 0x19a   :  { %v448_v30 = vmax.f32 %v424_v26, 0.0  ;;  %594 = vmatpush3.bf16.msra.mxu1 %v457_v14 }
 0x19b   :  { %v459_v31 = vpack.c.bf16 %v450_v28, %v449_v27  ;;  %595 = vmatprep.subr.bf16.mxu1 %v642_v23 }
 0x19c   :  { %v458_v32 = vpack.c.bf16 %v448_v30, %v447_v29 }
 0x19e   :  { %596 = vmatpush3.bf16.msra.mxu1 %v458_v32 }
 0x19f   :  { %597 = vmatprep.subr.bf16.mxu1 %v642_v23 }
 0x1a2   :  { %598 = vmatpush3.bf16.msra.mxu1 %v459_v31 }
 0x1a5   :  { %600 = vmatmul.mubr.bf16.vlgmr.msra.gmra.mrb[0].mxu1 %v451_v33 }
 0x278   :  { %v500_v35 = vpop.f32.mrb[0].mxu1 }
 0x279   :  { %v501_v36 = vadd.f32 %v500_v35, %v464_v34  ;;  %v601_v37 = vpop.f32.mrb[1].mxu1 }
 0x27a   :  { %v503_v38 = vpop.f32.mrb[2].mxu1 }
 0x27b   :  { %506 = vst [vmem:[#allocation4] sm:$0x7] %v501_v36  ;;  %v602_v39 = vpop.f32.mrb[3].mxu1 }
 0x27c   :  { %628 = shalt.err (!%p625_p4)
}
 0x27d   :  { %s629_s2 = scalar_lea.hbm %s856_s8, 64 }
 0x27e   :  { %p630_p5 = scmp.ne.s32.totalorder %s856_s8, %s629_s2  ;;  %p633_p6 = scmp.lt.u32.totalorder %s629_s2, %s856_s8 }
 0x280   :  { %p635_p7 = pnand %p633_p6, %p630_p5 }
 0x282   :  { %638 = shalt.err (!%p635_p7)
}
 0x283   :  { %516 = dma.vmem_to_hbm [thread:$0]  %s514_s14, 64, %s856_s8, [#allocation5]  }
 0x284   :  { %639 = dma.done.wait [#allocation5], 64  }
 0x285   :  { %640 = vsyncadd [#allocation5], 4294967232 }
 0x286   :  { %520 = vsyncpa [#allocation5], 1 }

</bundles_post_ra>
